<compile_context>
chip_gen: v7x
topology: tpu7x:2x2x1
jax: 0.10.0
libtpu: 0.0.40
codegen_flags: <defaults>
</compile_context>

<pallas_src>
import jax
import jax.numpy as jnp
from jax.experimental import pallas as pl
from jax.experimental.pallas import tpu as pltpu

_SUBLANE = 8
_LANE_CHOICES = (2048, 1024, 512, 256, 128)
_MAX_TILE_BYTES = 1 << 20  # ~1 MiB per array per pipeline buffer (safe on v5e/v6e/v7x)


def _block_rows(rows: int, lanes: int, itemsize: int) -> int:
    """Largest per-tile row count with tile <= _MAX_TILE_BYTES, multiple of 8."""
    br = max(1, _MAX_TILE_BYTES // (lanes * itemsize))
    if br >= rows:
        return rows  # single block covering the whole slab
    return max(_SUBLANE, (br // _SUBLANE) * _SUBLANE)


def _plan_layout(n: int, itemsize: int):
    """Pick (rows, lanes, block_rows, padded_n) for a lane-dense 2-D slab.

    Prefers the widest lane width that divides n exactly (no pad / no slice).
    Falls back to a padded 512-lane layout only for ragged sizes.
    """
    for lanes in _LANE_CHOICES:
        if n % lanes:
            continue
        rows = n // lanes
        br = _block_rows(rows, lanes, itemsize)
        if rows % br == 0:
            return rows, lanes, br, n
    # Ragged fallback: pad rows so they divide evenly into blocks.
    lanes = 512
    rows = -(-n // lanes)  # ceil
    br = _block_rows(rows, lanes, itemsize)
    if br < rows:
        rows = -(-rows // br) * br  # round rows up to a multiple of br
    else:
        br = rows
    return rows, lanes, br, rows * lanes


def _rosenbrock_kernel_factory(a: float, b: float):
    """Build an elementwise Rosenbrock kernel with static scalars a, b."""

    def kernel(x_ref, y_ref, o_ref):
        x = x_ref[...]
        y = y_ref[...]
        # (x - a)^2 + b * (y - x^2)^2  — all VPU elementwise ops
        t0 = x - a
        t1 = y - x * x
        o_ref[...] = t0 * t0 + b * (t1 * t1)

    return kernel


def rosenbrock(x: jax.Array, y: jax.Array, a: float, b: float) -> jax.Array:
    assert x.shape == y.shape, "Rosenbrock expects x and y with identical shapes"
    assert x.dtype == y.dtype
    orig_shape = x.shape
    n = x.size
    itemsize = jnp.dtype(x.dtype).itemsize

    rows, lanes, br, padded = _plan_layout(n, itemsize)

    x_flat = jnp.ravel(x)
    y_flat = jnp.ravel(y)
    if padded != n:
        pad = padded - n
        x_flat = jnp.pad(x_flat, (0, pad))
        y_flat = jnp.pad(y_flat, (0, pad))
    x2d = x_flat.reshape(rows, lanes)
    y2d = y_flat.reshape(rows, lanes)

    kernel = _rosenbrock_kernel_factory(float(a), float(b))
    grid = rows // br

    out2d = pl.pallas_call(
        kernel,
        out_shape=jax.ShapeDtypeStruct((rows, lanes), x.dtype),
        grid_spec=pl.GridSpec(
            grid=(grid,),
            in_specs=[
                pl.BlockSpec((br, lanes), lambda i: (i, 0)),
                pl.BlockSpec((br, lanes), lambda i: (i, 0)),
            ],
            out_specs=pl.BlockSpec((br, lanes), lambda i: (i, 0)),
        ),
        compiler_params=pltpu.CompilerParams(
            # Elementwise, fully independent blocks -> let v7x shard across
            # both TensorCores; no effect (and no harm) on v5e/v6e.
            dimension_semantics=("parallel",),
        ),
    )(x2d, y2d)

    if padded != n:
        return out2d.reshape(-1)[:n].reshape(orig_shape)
    return out2d.reshape(orig_shape)


if __name__ == "__main__":
    # Rosenbrock parameters (deterministic, in-script)
    a = 1.0
    b = 100.0

    key = jax.random.PRNGKey(0)
    kx, ky = jax.random.split(key)
    shape = (2, 4, 16, 16)  # NCHW-style small shape
    x = jax.random.normal(kx, shape, dtype=jnp.float32)
    y = jax.random.normal(ky, shape, dtype=jnp.float32)

    out = rosenbrock(x, y, a, b)
    out = jax.block_until_ready(out)

    # Correctness check against plain-JAX reference (mirrors the PyTorch forward)
    ref = (x - a) ** 2 + b * (y - x ** 2) ** 2
    assert out.shape == ref.shape
    assert jnp.allclose(out, ref, rtol=1e-6, atol=1e-6), "mismatch vs reference"

    print("KERNEL_OK")
</pallas_src>

<mosaic_0001>
module attributes {stable_mosaic.version = 11 : i64} {
  func.func @kernel(%arg0: i32, %arg1: memref<1x2048xf32, #tpu.memory_space<vmem>>, %arg2: memref<1x2048xf32, #tpu.memory_space<vmem>>, %arg3: memref<1x2048xf32, #tpu.memory_space<vmem>>) attributes {dimension_semantics = [#tpu.dimension_semantics<parallel>], iteration_bounds = array<i64: 1>, scalar_prefetch = 0 : i64, scratch_operands = 0 : i64, tpu.core_type = #tpu.core_type<tc>, window_params = [{transform_indices = @transform_0, window_bounds = array<i64: 1, 2048>}, {transform_indices = @transform_1, window_bounds = array<i64: 1, 2048>}, {transform_indices = @transform_2, window_bounds = array<i64: 1, 2048>}]} {
    %c0 = arith.constant 0 : index
    %c0_0 = arith.constant 0 : index
    %0 = vector.load %arg1[%c0, %c0_0] : memref<1x2048xf32, #tpu.memory_space<vmem>>, vector<1x2048xf32>
    %c0_1 = arith.constant 0 : index
    %c0_2 = arith.constant 0 : index
    %1 = vector.load %arg2[%c0_1, %c0_2] : memref<1x2048xf32, #tpu.memory_space<vmem>>, vector<1x2048xf32>
    %cst = arith.constant 1.000000e+00 : f32
    %2 = vector.broadcast %cst : f32 to vector<1x2048xf32>
    %3 = arith.subf %0, %2 : vector<1x2048xf32>
    %4 = arith.mulf %0, %0 : vector<1x2048xf32>
    %5 = arith.subf %1, %4 : vector<1x2048xf32>
    %6 = arith.mulf %3, %3 : vector<1x2048xf32>
    %7 = arith.mulf %5, %5 : vector<1x2048xf32>
    %cst_3 = arith.constant 1.000000e+02 : f32
    %8 = vector.broadcast %cst_3 : f32 to vector<1x2048xf32>
    %9 = arith.mulf %8, %7 : vector<1x2048xf32>
    %10 = arith.addf %6, %9 : vector<1x2048xf32>
    %c0_4 = arith.constant 0 : index
    %c0_5 = arith.constant 0 : index
    %11 = vector.load %arg3[%c0_4, %c0_5] : memref<1x2048xf32, #tpu.memory_space<vmem>>, vector<1x2048xf32>
    tpu.vector_store %arg3[%c0_4, %c0_5], %10 {strides = array<i32>} : memref<1x2048xf32, #tpu.memory_space<vmem>>, vector<1x2048xf32>,
    return
  }
  func.func @transform_0(%arg0: i32) -> (i32, i32) {
    %c0_i32 = arith.constant 0 : i32
    %c0_i32_0 = arith.constant 0 : i32
    return %arg0, %c0_i32 : i32, i32
  }
  func.func @transform_1(%arg0: i32) -> (i32, i32) {
    %c0_i32 = arith.constant 0 : i32
    %c0_i32_0 = arith.constant 0 : i32
    return %arg0, %c0_i32 : i32, i32
  }
  func.func @transform_2(%arg0: i32) -> (i32, i32) {
    %c0_i32 = arith.constant 0 : i32
    %c0_i32_0 = arith.constant 0 : i32
    return %arg0, %c0_i32 : i32, i32
  }
}

</mosaic_0001>

<bundles_post_ra>
// kernel: tpu_custom_call.1
= control target key start
LH: loop header
LB: loop body
LE: loop exit
PB: predicated region body
PF: predicated region fallthrough
CT: control target
= control target key end

     0   :  { %7 = vsyncpa [#allocation3], 0  ;;  %s203_s0 = inlined_call_operand.hbm [shape: f32[1,2048], index: 0, kind: input, shape index: {}]   ;;  %s204_s1 = inlined_call_operand.hbm [shape: f32[1,2048], index: 1, kind: input, shape index: {}]   ;;  %s205_s2 = inlined_call_operand.hbm [shape: f32[1,2048], index: 2, kind: output, shape index: {}]  }
   0x1   :  { %8 = vsyncpa [#allocation6], 0 }
   0x2   :  { %9 = vsyncpa [#allocation4], 0  ;;  %s149_s9 = smov [#allocation2]   ;;  %s150_s11 = smov [#allocation5]  }
   0x3   :  { %s16_s10 = sshll.u32 %s149_s9, 4  ;;  %s26_s12 = sshll.u32 %s150_s11, 4  ;;  %s17_s10 = int_to_ptr.vmem [resolvable:$true] %s16_s10  ;;  %s27_s12 = int_to_ptr.vmem [resolvable:$true] %s26_s12 }
   0x4   :  { %s77_s15 = scalar_lea.hbm %s203_s0, 256 }
   0x5   :  { %p78_p0 = scmp.ne.s32.totalorder %s203_s0, %s77_s15  ;;  %p81_p1 = scmp.lt.u32.totalorder %s77_s15, %s203_s0 }
   0x7   :  { %p83_p2 = pnand %p81_p1, %p78_p0 }
   0x9   :  { %86 = shalt.err (!%p83_p2)
}
   0xa   :  { %s87_s20 = scalar_lea.vmem %s17_s10, 256  ;;  %p92_p4 = scmp.lt.s32.totalorder %s17_s10, %s17_s10 }
   0xb   :  { %p88_p3 = scmp.ne.s32.totalorder %s17_s10, %s87_s20  ;;  %p93_p5 = scmp.lt.s32.totalorder %s87_s20, %s87_s20 }
   0xd   :  { %p94_p6 = por %p93_p5, %p92_p4 }
   0xf   :  { %p95_p7 = pnand %p94_p6, %p88_p3 }
  0x11   :  { %98 = shalt.err (!%p95_p7)
}
  0x12   :  { %19 = dma.hbm_to_vmem [thread:$0]  %s203_s0, 256, %s17_s10, [#allocation3]  }
  0x13   :  { %s99_s25 = scalar_lea.hbm %s204_s1, 256 }
  0x14   :  { %p100_p8 = scmp.ne.s32.totalorder %s204_s1, %s99_s25  ;;  %p103_p9 = scmp.lt.u32.totalorder %s99_s25, %s204_s1 }
  0x16   :  { %p105_p10 = pnand %p103_p9, %p100_p8 }
  0x18   :  { %108 = shalt.err (!%p105_p10)
}
  0x19   :  { %s109_s30 = scalar_lea.vmem %s27_s12, 256  ;;  %p114_p12 = scmp.lt.s32.totalorder %s27_s12, %s27_s12 }
  0x1a   :  { %p110_p11 = scmp.ne.s32.totalorder %s27_s12, %s109_s30  ;;  %p115_p13 = scmp.lt.s32.totalorder %s109_s30, %s109_s30 }
  0x1c   :  { %p116_p0 = por %p115_p13, %p114_p12 }
  0x1e   :  { %p117_p1 = pnand %p116_p0, %p110_p11 }
  0x20   :  { %120 = shalt.err (!%p117_p1)
}
  0x21   :  { %29 = dma.hbm_to_vmem [thread:$0]  %s204_s1, 256, %s27_s12, [#allocation6]  }
  0x22   :  { %143 = dma.done.wait [#allocation3], 256  }
  0x23   :  { %144 = vsyncadd [#allocation3], 4294967040 }
  0x24   :  { %145 = dma.done.wait [#allocation6], 256  }
  0x25   :  { %146 = vsyncadd [#allocation6], 4294967040  ;;  %v36_v0 = vld [vmem:[#allocation2] sm:$0xff]  ;;  %v38_v1 = vld [vmem:[#allocation5] sm:$0xff]  ;;  %s151_s4 = smov [#allocation7]  }
  0x26   :  { %v37_v2 = vld [vmem:[#allocation2 + $0x8] sm:$0xff]  ;;  %v72_v3 = vadd.f32 -1.0, %v36_v0  ;;  %v42_v4 = vmul.f32 %v36_v0, %v36_v0  ;;  %v39_v5 = vld [vmem:[#allocation5 + $0x8] sm:$0xff]  ;;  %s62_s1 = sshll.u32 %s151_s4, 4  ;;  %s63_s1 = int_to_ptr.vmem [resolvable:$true] %s62_s1 }
  0x27   :  { %v73_v6 = vadd.f32 -1.0, %v37_v2  ;;  %v43_v7 = vmul.f32 %v37_v2, %v37_v2  ;;  %s121_s5 = scalar_lea.vmem %s63_s1, 256  ;;  %p126_p3 = scmp.lt.s32.totalorder %s63_s1, %s63_s1 }
  0x28   :  { %v44_v8 = vsub.f32 %v38_v1, %v42_v4  ;;  %v46_v10 = vmul.f32 %v72_v3, %v72_v3  ;;  %p122_p2 = scmp.ne.s32.totalorder %s63_s1, %s121_s5  ;;  %p127_p4 = scmp.lt.s32.totalorder %s121_s5, %s121_s5 }
  0x29   :  { %v45_v9 = vsub.f32 %v39_v5, %v43_v7  ;;  %v47_v12 = vmul.f32 %v73_v6, %v73_v6 }
  0x2a   :  { %v48_v11 = vmul.f32 %v44_v8, %v44_v8  ;;  %p128_p5 = por %p127_p4, %p126_p3 }
  0x2b   :  { %v49_v13 = vmul.f32 %v45_v9, %v45_v9 }
  0x2c   :  { %v50_v14 = vmul.f32 100.0, %v48_v11  ;;  %p129_p6 = pnand %p128_p5, %p122_p2 }
  0x2d   :  { %v51_v15 = vmul.f32 100.0, %v49_v13 }
  0x2e   :  { %v52_v16 = vadd.f32 %v50_v14, %v46_v10 }
  0x2f   :  { %v53_v17 = vadd.f32 %v51_v15, %v47_v12 }
  0x30   :  { %54 = vst [vmem:[#allocation7] sm:$0xff] %v52_v16 }
  0x31   :  { %55 = vst [vmem:[#allocation7 + $0x8] sm:$0xff] %v53_v17 }
  0x32   :  { %132 = shalt.err (!%p129_p6)
}
  0x33   :  { %s133_s8 = scalar_lea.hbm %s205_s2, 256 }
  0x34   :  { %p134_p7 = scmp.ne.s32.totalorder %s205_s2, %s133_s8  ;;  %p137_p8 = scmp.lt.u32.totalorder %s133_s8, %s205_s2 }
  0x36   :  { %p139_p9 = pnand %p137_p8, %p134_p7 }
  0x38   :  { %142 = shalt.err (!%p139_p9)
}
  0x39   :  { %65 = dma.vmem_to_hbm [thread:$0]  %s63_s1, 256, %s205_s2, [#allocation4]  }
  0x3a   :  { %147 = dma.done.wait [#allocation4], 256  }
  0x3b   :  { %148 = vsyncadd [#allocation4], 4294967040 }
  0x3c   :  { %69 = vsyncpa [#allocation3], 1 }
  0x3d   :  { %70 = vsyncpa [#allocation6], 1 }
  0x3e   :  { %71 = vsyncpa [#allocation4], 1 }

</bundles_post_ra>
